<compile_context>
chip_gen: v7x
topology: tpu7x:2x2x1
jax: 0.10.0
libtpu: 0.0.40
codegen_flags: <defaults>
</compile_context>

<pallas_src>
import jax
import jax.numpy as jnp
from jax.experimental import pallas as pl
from jax.experimental.pallas import tpu as pltpu

_LANES = 128
_MAX_BLOCK_ROWS = 4096        # (4096, 128) f32 = 2 MiB/block; double-buffered
                              # total ~12 MiB -> safe on v5e/v6e/v7x VMEM.
_TILE_N_2D = 64 * 1024        # lane tile for the ragged-N kernel
_MIN_PALLAS_ELEMS = 64 * 1024 # below this, plain jnp beats a pallas launch
_VMEM_LIMIT = 32 * 1024 * 1024


def _round_up(x, m):
    return ((x + m - 1) // m) * m


def _axpby_rows_kernel(ab_ref, x_ref, o_ref):
    # ab_ref: SMEM (2,) f32 -> scalars a, b
    # x_ref : VMEM (2, bm, 128) tile of data.reshape(2, rows, 128)
    # o_ref : VMEM (bm, 128) output tile
    a = ab_ref[0]
    b = ab_ref[1]
    o_ref[...] = a * x_ref[0] + b * x_ref[1]


def _axpby_lanes_kernel(ab_ref, x_ref, o_ref):
    # ab_ref: SMEM (2,) f32 -> scalars a, b
    # x_ref : VMEM (2, tile_n) tile of data (lane-tiled, ragged tail masked)
    # o_ref : VMEM (1, tile_n) output tile
    a = ab_ref[0]
    b = ab_ref[1]
    o_ref[...] = a * x_ref[0:1, :] + b * x_ref[1:2, :]


def model_forward(data, a, b):
    """data: (2, N) f32; a, b: scalar f32 params. Returns (N,) f32."""
    assert data.ndim == 2 and data.shape[0] == 2
    n = data.shape[1]
    data = data.astype(jnp.float32)
    a = jnp.asarray(a, jnp.float32).reshape(())
    b = jnp.asarray(b, jnp.float32).reshape(())

    # ---- tiny inputs: a single fused XLA VPU op beats a pallas launch -------
    if n < _MIN_PALLAS_ELEMS:
        return a * data[0, :] + b * data[1, :]

    ab = jnp.stack([a, b])
    cost = pl.CostEstimate(flops=3 * n, transcendentals=0,
                           bytes_accessed=12 * n)  # read 2x4N, write 4N
    params = pltpu.CompilerParams(
        dimension_semantics=("parallel",),
        vmem_limit_bytes=_VMEM_LIMIT,
    )

    if n % _LANES == 0:
        # ---- main path: lane-dense (2, rows, 128) view, zero wrapper copies --
        rows = n // _LANES
        # Even number of blocks (>= 2) so v7x can shard across both TCs.
        num_blocks = 2 * pl.cdiv(rows, 2 * _MAX_BLOCK_ROWS)
        bm = min(_MAX_BLOCK_ROWS, _round_up(pl.cdiv(rows, num_blocks), 8))
        x = data.reshape(2, rows, _LANES)                      # free bitcast
        out2d = pl.pallas_call(
            _axpby_rows_kernel,
            out_shape=jax.ShapeDtypeStruct((rows, _LANES), jnp.float32),
            grid=(pl.cdiv(rows, bm),),
            in_specs=[
                pl.BlockSpec(memory_space=pltpu.SMEM),            # a, b
                pl.BlockSpec((2, bm, _LANES), lambda i: (0, i, 0)),
            ],
            out_specs=pl.BlockSpec((bm, _LANES), lambda i: (i, 0)),
            compiler_params=params,
            cost_estimate=cost,
        )(ab, x)
        return out2d.reshape(n)                                 # free bitcast

    # ---- ragged path: operate on (2, N) directly; last block masked ---------
    tile_n = min(_TILE_N_2D, n)
    out1xn = pl.pallas_call(
        _axpby_lanes_kernel,
        out_shape=jax.ShapeDtypeStruct((1, n), jnp.float32),
        grid=(pl.cdiv(n, tile_n),),
        in_specs=[
            pl.BlockSpec(memory_space=pltpu.SMEM),                # a, b
            pl.BlockSpec((2, tile_n), lambda i: (0, i)),
        ],
        out_specs=pl.BlockSpec((1, tile_n), lambda i: (0, i)),
        compiler_params=params,
        cost_estimate=cost,
    )(ab, data)
    return out1xn.reshape(n)


if __name__ == "__main__":
    key = jax.random.PRNGKey(0)
    k_data, k_a, k_b = jax.random.split(key, 3)

    # Deterministic "parameters" (mirroring nn.Parameter(torch.rand(1)))
    a = jax.random.uniform(k_a, (1,), dtype=jnp.float32)[0]
    b = jax.random.uniform(k_b, (1,), dtype=jnp.float32)[0]

    # Exercise: aligned Pallas path (N % 128 == 0, >= threshold), ragged/masked
    # Pallas path (N % 128 != 0, >= threshold), and the tiny-N jnp fast path.
    for n in (1024 * 128, 100000, 256, 200):
        data = jax.random.normal(k_data, (2, n), dtype=jnp.float32)
        out = jax.block_until_ready(model_forward(data, a, b))
        ref = a * data[0, :] + b * data[1, :]
        assert out.shape == (n,), (out.shape, n)
        assert jnp.allclose(out, ref, atol=1e-6, rtol=1e-6), n

    print("KERNEL_OK")
</pallas_src>

<mosaic_0001>
module attributes {stable_mosaic.version = 11 : i64} {
  func.func @_axpby_rows_kernel(%arg0: i32, %arg1: memref<2xf32, #tpu.memory_space<smem>>, %arg2: memref<2x512x128xf32, #tpu.memory_space<vmem>>, %arg3: memref<512x128xf32, #tpu.memory_space<vmem>>) attributes {dimension_semantics = [#tpu.dimension_semantics<parallel>], iteration_bounds = array<i64: 2>, scalar_prefetch = 0 : i64, scratch_operands = 0 : i64, tpu.core_type = #tpu.core_type<tc>, window_params = [{transform_indices = @transform_0, window_bounds = array<i64: 2>}, {transform_indices = @transform_1, window_bounds = array<i64: 2, 512, 128>}, {transform_indices = @transform_2, window_bounds = array<i64: 512, 128>}]} {
    %c0 = arith.constant 0 : index
    %0 = memref.load %arg1[%c0] : memref<2xf32, #tpu.memory_space<smem>>
    %c1 = arith.constant 1 : index
    %1 = memref.load %arg1[%c1] : memref<2xf32, #tpu.memory_space<smem>>
    %c0_0 = arith.constant 0 : index
    %c0_1 = arith.constant 0 : index
    %c0_2 = arith.constant 0 : index
    %2 = vector.load %arg2[%c0_0, %c0_1, %c0_2] : memref<2x512x128xf32, #tpu.memory_space<vmem>>, vector<1x512x128xf32>
    %3 = vector.shape_cast %2 : vector<1x512x128xf32> to vector<512x128xf32>
    %4 = vector.broadcast %0 : f32 to vector<512x128xf32>
    %5 = arith.mulf %4, %3 : vector<512x128xf32>
    %c1_3 = arith.constant 1 : index
    %c0_4 = arith.constant 0 : index
    %c0_5 = arith.constant 0 : index
    %6 = vector.load %arg2[%c1_3, %c0_4, %c0_5] : memref<2x512x128xf32, #tpu.memory_space<vmem>>, vector<1x512x128xf32>
    %7 = vector.shape_cast %6 : vector<1x512x128xf32> to vector<512x128xf32>
    %8 = vector.broadcast %1 : f32 to vector<512x128xf32>
    %9 = arith.mulf %8, %7 : vector<512x128xf32>
    %10 = arith.addf %5, %9 : vector<512x128xf32>
    %c0_6 = arith.constant 0 : index
    %c0_7 = arith.constant 0 : index
    %11 = vector.load %arg3[%c0_6, %c0_7] : memref<512x128xf32, #tpu.memory_space<vmem>>, vector<512x128xf32>
    tpu.vector_store %arg3[%c0_6, %c0_7], %10 {strides = array<i32>} : memref<512x128xf32, #tpu.memory_space<vmem>>, vector<512x128xf32>,
    return
  }
  func.func @transform_0(%arg0: i32) -> i32 {
    %c0_i32 = arith.constant 0 : i32
    %c0_i32_0 = arith.constant 0 : i32
    return %c0_i32 : i32
  }
  func.func @transform_1(%arg0: i32) -> (i32, i32, i32) {
    %c0_i32 = arith.constant 0 : i32
    %c0_i32_0 = arith.constant 0 : i32
    %c0_i32_1 = arith.constant 0 : i32
    return %c0_i32, %arg0, %c0_i32_0 : i32, i32, i32
  }
  func.func @transform_2(%arg0: i32) -> (i32, i32) {
    %c0_i32 = arith.constant 0 : i32
    %c0_i32_0 = arith.constant 0 : i32
    return %arg0, %c0_i32 : i32, i32
  }
}

</mosaic_0001>

<bundles_post_ra>
// kernel: tpu_custom_call.1
= control target key start
LH: loop header
LB: loop body
LE: loop exit
PB: predicated region body
PF: predicated region fallthrough
CT: control target
= control target key end

     0   :  { %7 = vsyncpa [#allocation5], 0  ;;  %s1452_s0 = inlined_call_operand.hbm [shape: f32[2], index: 0, kind: input, shape index: {}]   ;;  %s1453_s1 = inlined_call_operand.hbm [shape: f32[2,1024,128], index: 1, kind: input, shape index: {}]   ;;  %s1454_s2 = inlined_call_operand.hbm [shape: f32[1024,128], index: 2, kind: output, shape index: {}]  }
   0x1   :  { %8 = vsyncpa [#allocation3], 0 }
   0x2   :  { %10 = vsyncpa [#allocation3 + $0x1], 0 }
   0x3   :  { %11 = vsyncpa [#allocation4], 0 }
   0x4   :  { %13 = vsyncpa [#allocation4 + $0x1], 0  ;;  %s951_s9 = smov 0   ;;  %s953_s10 = smov 0  }
   0x5   :  { %s955_s11 = smov 0   ;;  %s957_s12 = smov 0  }
   0x6 LB: > { %s972_s13 = sadd.s32 4294967295, %s924_s12   ;;  %s689_s14 = sadd.s32 4294967294, %s924_s12   ;;  %s924_s12 = sphi %s957_s12, %s1463_s12   ;;  %s920_s11 = sphi %s955_s11, %s1462_s11   ;;  %s916_s10 = sphi %s953_s10, %s1461_s10   ;;  %s912_s9 = sphi %s951_s9, %s1460_s9  }
   0x7   : > { %s976_s15 = sadd.s32 1, %s924_s12   ;;  %s47_s16 = sadd.s32 1, %s920_s11 }
   0x8   : > { %s44_s17 = ssub.s32 %s924_s12, %s976_s15  ;;  %p54_p0 = scmp.ne.s32.totalorder %s920_s11, %s916_s10 }
   0x9   : > { %p45_p1 = scmp.eq.s32.totalorder %s44_s17, 0  ;;  %p55_p2 = scmp.eq.s32.totalorder %s924_s12, 0 }
   0xa   : > { %p60_p3 = scmp.ne.s32.totalorder %s916_s10, %s912_s9  ;;  %p61_p4 = scmp.eq.s32.totalorder %s972_s13, 0 }
   0xb   : > { %s988_s18 = scalar_select %p45_p1, %s920_s11, %s47_s16  }
   0xc   : > { %p990_p5 = por %p55_p2, %p54_p0  ;;  %p996_p6 = por %p61_p4, %p60_p3 }
   0xd   : > { %p84_p7 = scmp.eq.s32.totalorder %s972_s13, 1  ;;  %p90_p8 = scmp.eq.s32.totalorder %s689_s14, 1 }
   0xe   : > { %p690_p9 = scmp.ge.s32.totalorder %s924_s12, 1  ;;  %p97_p10 = scmp.lt.s32.totalorder %s924_s12, 3 }
   0xf   : > { %p1003_p11 = por %p84_p7, %p54_p0  ;;  %p1007_p12 = por %p90_p8, %p60_p3 }
  0x10   : > { %p1011_p13 = pnand %p690_p9, %p97_p10  ;;  %s841_s26 = scalar_lea.hbm %s1452_s0, 16 }
  0x11   : > { %p842_p0 = scmp.ne.s32.totalorder %s1452_s0, %s841_s26  ;;  %p848_p9 = scmp.lt.u32.totalorder %s841_s26, %s1452_s0 }
  0x12   : > { %p789_p1 = pneg %p1011_p13 }
  0x14   : > { %p790_p2 = pnand %p789_p1, %p61_p4 }
  0x16   : > { %p843_p3 = pneg %p790_p2 }
  0x18   : > { %p844_p7 = pnand %p843_p3, %p842_p0 }
  0x1a   : > { %p845_p8 = pneg %p844_p7 }
  0x1c   : > { %p850_p10 = pnand %p848_p9, %p845_p8 }
  0x1e   : > { %853 = shalt.err (!%p850_p10)
}
  0x1f   : > { %s926_s3 = smov [#allocation2]   ;;  %p692_p1 = scmp.ge.s32.totalorder %s924_s12, 2 }
  0x20   : > { %792 = dma.hbm_to_smem (!%p790_p2), %s1452_s0, 16, %s926_s3, [#allocation5]  }
  0x21   : > { %115 = sbr.rel (%p692_p1) target bundleno = 53 (0x35), region = 20 }
  0x28   : > { %s119_s6 = sand.u32 1, %s920_s11   ;;  %s772_s7 = sshll.u32 %s924_s12, 13 }
  0x29   : > { %s693_s8 = sshll.u32 %s119_s6, 10  ;;  %s129_s17 = scalar_lea.hbm %s1453_s1, %s772_s7 }
  0x2a   : > { %s776_s24 = scalar_select %p990_p5, [#allocation0], [#allocation10] }
  0x2b   : > { %s123_s25 = scalar_lea.vmem [#allocation6], %s693_s8  ;;  %s927_s28 = smov 16384  }
  0x2c   : > { %s142_s26 = sshll.u32 %s123_s25, 4  ;;  %s134_s27 = sld [smem:[%s776_s24]]   ;;  %s143_s26 = int_to_ptr.vmem [resolvable:$true] %s142_s26 }
  0x2d   : > { %777 = sst [smem:[#allocation9]] (%p990_p5), %s927_s28  ;;  %s928_s29 = smov 8192  }
  0x2e   : > { %778 = sst [smem:[#allocation9 + $0x1]] (%p990_p5), %s928_s29  ;;  %s929_s30 = smov 64  }
  0x2f   : > { %779 = sst [smem:[#allocation9 + $0x2]] (%p990_p5), %s929_s30  ;;  %s930_s3 = smov 128  }
  0x30   : > { %780 = sst [smem:[#allocation9 + $0x3]] (%p990_p5), %s930_s3  ;;  %s931_s5 = smov 8  }
  0x31   : > { %781 = sst [smem:[#allocation9 + $0x4]] (%p990_p5), %s930_s3  ;;  %s120_s8 = scalar_lea.sflag [#allocation3], %s119_s6 }
  0x32   : > { %s696_s4 = sshll.u32 %s134_s27, 26  ;;  %782 = sst [smem:[#allocation9 + $0x5]] (%p990_p5), %s931_s5 }
  0x33   : > { %s697_s7 = sadd.s32 134217728, %s696_s4  ;;  %s932_s14 = smov [#allocation8]  }
  0x34   : > { %783 = dma.general (%p990_p5), %s129_s17, 16384, %s143_s26, %s120_s8, %s932_s14, [#allocation9], %s697_s7, 0  }
  0x35 PF: > { %167 = sbr.rel (%p1011_p13) target bundleno = 143 (0x8f), region = 28 }
  0x3c   : > { %899 = dma.done.wait (%p61_p4), [#allocation5], 16  }
  0x3d   : > { %901 = vsyncadd (%p61_p4), [#allocation5], 4294967280  ;;  %s1062_s16 = sand.u32 1, %s916_s10  }
  0x3e   : > { %s700_s6 = sshll.u32 %s1062_s16, 10  ;;  %s174_s24 = scalar_lea.sflag [#allocation3], %s1062_s16 }
  0x3f   : > { %s1066_s19 = scalar_lea.vmem [#allocation6], %s700_s6 }
  0x40   : > { %903 = dma.done.wait (%p996_p6), %s174_s24, 16384  }
  0x41   : > { %905 = vsyncadd (%p996_p6), %s174_s24, 4294950912 }
  0x42   : > { %182 = sfence }
  0x43   : > { %s201_s23 = sld [smem:[#allocation2]]  ;;  %s702_s17 = sld [smem:[#allocation2 + $0x1]]  ;;  %v203_v0 = vld [vmem:[%s1066_s19] sm:$0xff]  ;;  %v204_v2 = vld [vmem:[%s1066_s19 + $0x8] sm:$0xff]  ;;  %v205_v4 = vld [vmem:[%s1066_s19 + $0x10] sm:$0xff] }
  0x44   : > { %v703_v1 = vld [vmem:[%s1066_s19 + $0x200] sm:$0xff]  ;;  %v704_v3 = vld [vmem:[%s1066_s19 + $0x208] sm:$0xff]  ;;  %v705_v5 = vld [vmem:[%s1066_s19 + $0x210] sm:$0xff]  ;;  %s701_s20 = sshll.u32 %s1062_s16, 9  ;;  %s773_s26 = sshll.u32 %s972_s13, 13 }
  0x45   : > { %v206_v6 = vld [vmem:[%s1066_s19 + $0x18] sm:$0xff]  ;;  %v207_v9 = vld [vmem:[%s1066_s19 + $0x20] sm:$0xff]  ;;  %v208_v11 = vld [vmem:[%s1066_s19 + $0x28] sm:$0xff]  ;;  %s1116_s25 = scalar_lea.vmem [#allocation7], %s701_s20  ;;  %s1402_s29 = scalar_lea.hbm %s1454_s2, %s773_s26 }
  0x46   : > { %v706_v7 = vld [vmem:[%s1066_s19 + $0x218] sm:$0xff]  ;;  %v707_v10 = vld [vmem:[%s1066_s19 + $0x220] sm:$0xff]  ;;  %v708_v16 = vld [vmem:[%s1066_s19 + $0x228] sm:$0xff]  ;;  %s604_s27 = sshll.u32 %s1116_s25, 4  ;;  %s591_s30 = scalar_lea.sflag [#allocation4], %s1062_s16  ;;  %s1404_s27 = int_to_ptr.vmem [resolvable:$true] %s604_s27 }
  0x47   : > { %v209_v21 = vld [vmem:[%s1066_s19 + $0x30] sm:$0xff]  ;;  %v210_v27 = vld [vmem:[%s1066_s19 + $0x38] sm:$0xff]  ;;  %v211_v29 = vld [vmem:[%s1066_s19 + $0x40] sm:$0xff]  ;;  %s854_s3 = scalar_lea.vmem %s1404_s27, 8192  ;;  %s933_s4 = smov [#allocation7]  }
  0x48   : > { %v709_v22 = vld [vmem:[%s1066_s19 + $0x230] sm:$0xff]  ;;  %v710_v28 = vld [vmem:[%s1066_s19 + $0x238] sm:$0xff]  ;;  %v711_v34 = vld [vmem:[%s1066_s19 + $0x240] sm:$0xff]  ;;  %p855_p4 = scmp.ne.s32.totalorder %s1404_s27, %s854_s3  ;;  %s858_s5 = sshll.u32 %s933_s4, 4  ;;  %s859_s5 = int_to_ptr.vmem [resolvable:$false] %s858_s5 }
  0x49   : > { %v1081_v8 = vstv %s201_s23  ;;  %v1087_v13 = vstv %s702_s17  ;;  %v212_v35 = vld [vmem:[%s1066_s19 + $0x48] sm:$0xff]  ;;  %v213_v41 = vld [vmem:[%s1066_s19 + $0x50] sm:$0xff]  ;;  %s860_s7 = scalar_lea.vmem %s859_s5, 16384  ;;  %p861_p13 = scmp.lt.s32.totalorder %s1404_s27, %s859_s5 }
  0x4a   : > { %v268_v12 = vmul.f32 %v1081_v8, %v203_v0  ;;  %v269_v14 = vmul.f32 %v1081_v8, %v204_v2  ;;  %v270_v15 = vmul.f32 %v1081_v8, %v205_v4  ;;  %v398_v17 = vmul.f32 %v703_v1, %v1087_v13  ;;  %v712_v36 = vld [vmem:[%s1066_s19 + $0x248] sm:$0xff]  ;;  %v713_v42 = vld [vmem:[%s1066_s19 + $0x250] sm:$0xff]  ;;  %v214_v43 = vld [vmem:[%s1066_s19 + $0x58] sm:$0xff]  ;;  %p856_p5 = pnand %p855_p4, %p1003_p11  ;;  %p862_p2 = scmp.lt.s32.totalorder %s860_s7, %s854_s3 }
  0x4b   : > { %v399_v18 = vmul.f32 %v704_v3, %v1087_v13  ;;  %v400_v19 = vmul.f32 %v705_v5, %v1087_v13  ;;  %v271_v20 = vmul.f32 %v1081_v8, %v206_v6  ;;  %v401_v23 = vmul.f32 %v706_v7, %v1087_v13  ;;  %v714_v48 = vld [vmem:[%s1066_s19 + $0x258] sm:$0xff]  ;;  %v215_v49 = vld [vmem:[%s1066_s19 + $0x60] sm:$0xff]  ;;  %v216_v55 = vld [vmem:[%s1066_s19 + $0x68] sm:$0xff] }
  0x4c   : > { %v272_v24 = vmul.f32 %v1081_v8, %v207_v9  ;;  %v402_v25 = vmul.f32 %v707_v10, %v1087_v13  ;;  %v273_v26 = vmul.f32 %v1081_v8, %v208_v11  ;;  %v462_v30 = vadd.f32 %v398_v17, %v268_v12  ;;  %v715_v54 = vld [vmem:[%s1066_s19 + $0x260] sm:$0xff]  ;;  %v716_v56 = vld [vmem:[%s1066_s19 + $0x268] sm:$0xff]  ;;  %v217_v61 = vld [vmem:[%s1066_s19 + $0x70] sm:$0xff]  ;;  %p857_p6 = pneg %p856_p5  ;;  %p863_p0 = por %p862_p2, %p861_p13 }
  0x4d   : > { %v463_v31 = vadd.f32 %v399_v18, %v269_v14  ;;  %v464_v32 = vadd.f32 %v400_v19, %v270_v15  ;;  %v403_v33 = vmul.f32 %v708_v16, %v1087_v13  ;;  %v465_v37 = vadd.f32 %v401_v23, %v271_v20  ;;  %v717_v62 = vld [vmem:[%s1066_s19 + $0x270] sm:$0xff]  ;;  %v218_v63 = vld [vmem:[%s1066_s19 + $0x78] sm:$0xff]  ;;  %v219_v5 = vld [vmem:[%s1066_s19 + $0x80] sm:$0xff] }
  0x4e   : > { %v466_v38 = vadd.f32 %v402_v25, %v272_v24  ;;  %v274_v39 = vmul.f32 %v1081_v8, %v209_v21  ;;  %v404_v40 = vmul.f32 %v709_v22, %v1087_v13  ;;  %526 = vst [vmem:[%s1116_s25] sm:$0xff] %v462_v30  ;;  %v275_v45 = vmul.f32 %v1081_v8, %v210_v27  ;;  %v718_v4 = vld [vmem:[%s1066_s19 + $0x278] sm:$0xff]  ;;  %v719_v11 = vld [vmem:[%s1066_s19 + $0x280] sm:$0xff]  ;;  %v220_v12 = vld [vmem:[%s1066_s19 + $0x88] sm:$0xff]  ;;  %p864_p3 = pnand %p863_p0, %p857_p6 }
  0x4f   : > { %527 = vst [vmem:[%s1116_s25 + $0x8] sm:$0xff] %v463_v31  ;;  %528 = vst [vmem:[%s1116_s25 + $0x10] sm:$0xff] %v464_v32  ;;  %v467_v44 = vadd.f32 %v403_v33, %v273_v26  ;;  %v405_v46 = vmul.f32 %v710_v28, %v1087_v13  ;;  %v276_v47 = vmul.f32 %v1081_v8, %v211_v29  ;;  %v720_v14 = vld [vmem:[%s1066_s19 + $0x288] sm:$0xff]  ;;  %v221_v19 = vld [vmem:[%s1066_s19 + $0x90] sm:$0xff] }
  0x50   : > { %529 = vst [vmem:[%s1116_s25 + $0x18] sm:$0xff] %v465_v37  ;;  %530 = vst [vmem:[%s1116_s25 + $0x20] sm:$0xff] %v466_v38  ;;  %v468_v50 = vadd.f32 %v404_v40, %v274_v39  ;;  %v406_v51 = vmul.f32 %v711_v34, %v1087_v13  ;;  %v277_v52 = vmul.f32 %v1081_v8, %v212_v35  ;;  %v721_v20 = vld [vmem:[%s1066_s19 + $0x290] sm:$0xff]  ;;  %v222_v21 = vld [vmem:[%s1066_s19 + $0x98] sm:$0xff] }
  0x51   : > { %v407_v53 = vmul.f32 %v712_v36, %v1087_v13  ;;  %531 = vst [vmem:[%s1116_s25 + $0x28] sm:$0xff] %v467_v44  ;;  %v469_v57 = vadd.f32 %v405_v46, %v275_v45  ;;  %v278_v58 = vmul.f32 %v1081_v8, %v213_v41  ;;  %v408_v59 = vmul.f32 %v713_v42, %v1087_v13  ;;  %v722_v26 = vld [vmem:[%s1066_s19 + $0x298] sm:$0xff]  ;;  %v223_v27 = vld [vmem:[%s1066_s19 + $0xa0] sm:$0xff]  ;;  %v224_v33 = vld [vmem:[%s1066_s19 + $0xa8] sm:$0xff] }
  0x52   : > { %v279_v60 = vmul.f32 %v1081_v8, %v214_v43  ;;  %532 = vst [vmem:[%s1116_s25 + $0x30] sm:$0xff] %v468_v50  ;;  %v470_v0 = vadd.f32 %v406_v51, %v276_v47  ;;  %v409_v2 = vmul.f32 %v714_v48, %v1087_v13  ;;  %v280_v3 = vmul.f32 %v1081_v8, %v215_v49  ;;  %v723_v32 = vld [vmem:[%s1066_s19 + $0x2a0] sm:$0xff]  ;;  %v724_v34 = vld [vmem:[%s1066_s19 + $0x2a8] sm:$0xff]  ;;  %v225_v39 = vld [vmem:[%s1066_s19 + $0xb0] sm:$0xff] }
  0x53   : > { %v471_v1 = vadd.f32 %v407_v53, %v277_v52  ;;  %533 = vst [vmem:[%s1116_s25 + $0x38] sm:$0xff] %v469_v57  ;;  %v472_v6 = vadd.f32 %v408_v59, %v278_v58  ;;  %v410_v7 = vmul.f32 %v715_v54, %v1087_v13  ;;  %v281_v9 = vmul.f32 %v1081_v8, %v216_v55  ;;  %v725_v40 = vld [vmem:[%s1066_s19 + $0x2b0] sm:$0xff]  ;;  %v226_v41 = vld [vmem:[%s1066_s19 + $0xb8] sm:$0xff]  ;;  %v227_v47 = vld [vmem:[%s1066_s19 + $0xc0] sm:$0xff] }
  0x54   : > { %v411_v10 = vmul.f32 %v716_v56, %v1087_v13  ;;  %534 = vst [vmem:[%s1116_s25 + $0x40] sm:$0xff] %v470_v0  ;;  %v473_v15 = vadd.f32 %v409_v2, %v279_v60  ;;  %v282_v16 = vmul.f32 %v1081_v8, %v217_v61  ;;  %v412_v17 = vmul.f32 %v717_v62, %v1087_v13  ;;  %v726_v46 = vld [vmem:[%s1066_s19 + $0x2b8] sm:$0xff]  ;;  %v727_v52 = vld [vmem:[%s1066_s19 + $0x2c0] sm:$0xff]  ;;  %v228_v53 = vld [vmem:[%s1066_s19 + $0xc8] sm:$0xff] }
  0x55   : > { %535 = vst [vmem:[%s1116_s25 + $0x48] sm:$0xff] %v471_v1  ;;  %v283_v18 = vmul.f32 %v1081_v8, %v218_v63  ;;  %536 = vst [vmem:[%s1116_s25 + $0x50] sm:$0xff] %v472_v6  ;;  %v474_v22 = vadd.f32 %v410_v7, %v280_v3  ;;  %v413_v24 = vmul.f32 %v718_v4, %v1087_v13  ;;  %v728_v54 = vld [vmem:[%s1066_s19 + $0x2c8] sm:$0xff]  ;;  %v229_v59 = vld [vmem:[%s1066_s19 + $0xd0] sm:$0xff] }
  0x56   : > { %v475_v23 = vadd.f32 %v411_v10, %v281_v9  ;;  %v284_v25 = vmul.f32 %v1081_v8, %v219_v5  ;;  %537 = vst [vmem:[%s1116_s25 + $0x58] sm:$0xff] %v473_v15  ;;  %v476_v28 = vadd.f32 %v412_v17, %v282_v16  ;;  %v414_v29 = vmul.f32 %v719_v11, %v1087_v13  ;;  %v729_v60 = vld [vmem:[%s1066_s19 + $0x2d0] sm:$0xff]  ;;  %v230_v61 = vld [vmem:[%s1066_s19 + $0xd8] sm:$0xff]  ;;  %v231_v3 = vld [vmem:[%s1066_s19 + $0xe0] sm:$0xff] }
  0x57   : > { %v285_v30 = vmul.f32 %v1081_v8, %v220_v12  ;;  %v415_v31 = vmul.f32 %v720_v14, %v1087_v13  ;;  %538 = vst [vmem:[%s1116_s25 + $0x60] sm:$0xff] %v474_v22  ;;  %v477_v35 = vadd.f32 %v413_v24, %v283_v18  ;;  %v286_v36 = vmul.f32 %v1081_v8, %v221_v19  ;;  %v730_v2 = vld [vmem:[%s1066_s19 + $0x2d8] sm:$0xff]  ;;  %v731_v9 = vld [vmem:[%s1066_s19 + $0x2e0] sm:$0xff]  ;;  %v232_v10 = vld [vmem:[%s1066_s19 + $0xe8] sm:$0xff] }
  0x58   : > { %539 = vst [vmem:[%s1116_s25 + $0x68] sm:$0xff] %v475_v23  ;;  %v416_v37 = vmul.f32 %v721_v20, %v1087_v13  ;;  %v287_v38 = vmul.f32 %v1081_v8, %v222_v21  ;;  %540 = vst [vmem:[%s1116_s25 + $0x70] sm:$0xff] %v476_v28  ;;  %v478_v42 = vadd.f32 %v414_v29, %v284_v25  ;;  %v732_v11 = vld [vmem:[%s1066_s19 + $0x2e8] sm:$0xff]  ;;  %v233_v17 = vld [vmem:[%s1066_s19 + $0xf0] sm:$0xff] }
  0x59   : > { %v479_v43 = vadd.f32 %v415_v31, %v285_v30  ;;  %v417_v44 = vmul.f32 %v722_v26, %v1087_v13  ;;  %v288_v45 = vmul.f32 %v1081_v8, %v223_v27  ;;  %541 = vst [vmem:[%s1116_s25 + $0x78] sm:$0xff] %v477_v35  ;;  %v418_v49 = vmul.f32 %v723_v32, %v1087_v13  ;;  %v733_v18 = vld [vmem:[%s1066_s19 + $0x2f0] sm:$0xff]  ;;  %v234_v19 = vld [vmem:[%s1066_s19 + $0xf8] sm:$0xff]  ;;  %v235_v25 = vld [vmem:[%s1066_s19 + $0x100] sm:$0xff] }
  0x5a   : > { %v480_v48 = vadd.f32 %v416_v37, %v286_v36  ;;  %v289_v50 = vmul.f32 %v1081_v8, %v224_v33  ;;  %v419_v51 = vmul.f32 %v724_v34, %v1087_v13  ;;  %542 = vst [vmem:[%s1116_s25 + $0x80] sm:$0xff] %v478_v42  ;;  %v290_v56 = vmul.f32 %v1081_v8, %v225_v39  ;;  %v734_v24 = vld [vmem:[%s1066_s19 + $0x2f8] sm:$0xff]  ;;  %v735_v30 = vld [vmem:[%s1066_s19 + $0x300] sm:$0xff]  ;;  %v236_v31 = vld [vmem:[%s1066_s19 + $0x108] sm:$0xff] }
  0x5b   : > { %543 = vst [vmem:[%s1116_s25 + $0x88] sm:$0xff] %v479_v43  ;;  %v481_v55 = vadd.f32 %v417_v44, %v287_v38  ;;  %v420_v57 = vmul.f32 %v725_v40, %v1087_v13  ;;  %v291_v58 = vmul.f32 %v1081_v8, %v226_v41  ;;  %v482_v62 = vadd.f32 %v418_v49, %v288_v45  ;;  %v736_v32 = vld [vmem:[%s1066_s19 + $0x308] sm:$0xff]  ;;  %v237_v37 = vld [vmem:[%s1066_s19 + $0x110] sm:$0xff]  ;;  %v238_v39 = vld [vmem:[%s1066_s19 + $0x118] sm:$0xff] }
  0x5c   : > { %544 = vst [vmem:[%s1116_s25 + $0x90] sm:$0xff] %v480_v48  ;;  %v483_v63 = vadd.f32 %v419_v51, %v289_v50  ;;  %v421_v0 = vmul.f32 %v726_v46, %v1087_v13  ;;  %v292_v1 = vmul.f32 %v1081_v8, %v227_v47  ;;  %v422_v5 = vmul.f32 %v727_v52, %v1087_v13  ;;  %v737_v38 = vld [vmem:[%s1066_s19 + $0x310] sm:$0xff]  ;;  %v738_v44 = vld [vmem:[%s1066_s19 + $0x318] sm:$0xff]  ;;  %v239_v45 = vld [vmem:[%s1066_s19 + $0x120] sm:$0xff] }
  0x5d   : > { %545 = vst [vmem:[%s1116_s25 + $0x98] sm:$0xff] %v481_v55  ;;  %v484_v4 = vadd.f32 %v420_v57, %v290_v56  ;;  %v293_v6 = vmul.f32 %v1081_v8, %v228_v53  ;;  %v423_v7 = vmul.f32 %v728_v54, %v1087_v13  ;;  %546 = vst [vmem:[%s1116_s25 + $0xa0] sm:$0xff] %v482_v62  ;;  %v739_v50 = vld [vmem:[%s1066_s19 + $0x320] sm:$0xff]  ;;  %v240_v51 = vld [vmem:[%s1066_s19 + $0x128] sm:$0xff] }
  0x5e   : > { %547 = vst [vmem:[%s1116_s25 + $0xa8] sm:$0xff] %v483_v63  ;;  %v485_v12 = vadd.f32 %v421_v0, %v291_v58  ;;  %v294_v14 = vmul.f32 %v1081_v8, %v229_v59  ;;  %v424_v15 = vmul.f32 %v729_v60, %v1087_v13  ;;  %v295_v16 = vmul.f32 %v1081_v8, %v230_v61  ;;  %v740_v52 = vld [vmem:[%s1066_s19 + $0x328] sm:$0xff]  ;;  %v241_v57 = vld [vmem:[%s1066_s19 + $0x130] sm:$0xff]  ;;  %v242_v59 = vld [vmem:[%s1066_s19 + $0x138] sm:$0xff] }
  0x5f   : > { %548 = vst [vmem:[%s1116_s25 + $0xb0] sm:$0xff] %v484_v4  ;;  %v486_v20 = vadd.f32 %v422_v5, %v292_v1  ;;  %v487_v21 = vadd.f32 %v423_v7, %v293_v6  ;;  %v425_v22 = vmul.f32 %v730_v2, %v1087_v13  ;;  %v296_v23 = vmul.f32 %v1081_v8, %v231_v3  ;;  %v741_v58 = vld [vmem:[%s1066_s19 + $0x330] sm:$0xff]  ;;  %v742_v0 = vld [vmem:[%s1066_s19 + $0x338] sm:$0xff]  ;;  %v243_v1 = vld [vmem:[%s1066_s19 + $0x140] sm:$0xff] }
  0x60   : > { %549 = vst [vmem:[%s1116_s25 + $0xb8] sm:$0xff] %v485_v12  ;;  %v488_v26 = vadd.f32 %v424_v15, %v294_v14  ;;  %v426_v27 = vmul.f32 %v731_v9, %v1087_v13  ;;  %v297_v28 = vmul.f32 %v1081_v8, %v232_v10  ;;  %v427_v29 = vmul.f32 %v732_v11, %v1087_v13  ;;  %v743_v6 = vld [vmem:[%s1066_s19 + $0x340] sm:$0xff]  ;;  %v244_v7 = vld [vmem:[%s1066_s19 + $0x148] sm:$0xff]  ;;  %v245_v15 = vld [vmem:[%s1066_s19 + $0x150] sm:$0xff] }
  0x61   : > { %550 = vst [vmem:[%s1116_s25 + $0xc0] sm:$0xff] %v486_v20  ;;  %551 = vst [vmem:[%s1116_s25 + $0xc8] sm:$0xff] %v487_v21  ;;  %v489_v33 = vadd.f32 %v425_v22, %v295_v16  ;;  %v298_v34 = vmul.f32 %v1081_v8, %v233_v17  ;;  %v428_v35 = vmul.f32 %v733_v18, %v1087_v13  ;;  %v744_v9 = vld [vmem:[%s1066_s19 + $0x348] sm:$0xff]  ;;  %v745_v16 = vld [vmem:[%s1066_s19 + $0x350] sm:$0xff] }
  0x62   : > { %v299_v36 = vmul.f32 %v1081_v8, %v234_v19  ;;  %552 = vst [vmem:[%s1116_s25 + $0xd0] sm:$0xff] %v488_v26  ;;  %v490_v40 = vadd.f32 %v426_v27, %v296_v23  ;;  %v491_v41 = vadd.f32 %v427_v29, %v297_v28  ;;  %v429_v42 = vmul.f32 %v734_v24, %v1087_v13  ;;  %v246_v17 = vld [vmem:[%s1066_s19 + $0x158] sm:$0xff]  ;;  %v247_v23 = vld [vmem:[%s1066_s19 + $0x160] sm:$0xff]  ;;  %v248_v29 = vld [vmem:[%s1066_s19 + $0x168] sm:$0xff] }
  0x63   : > { %v300_v43 = vmul.f32 %v1081_v8, %v235_v25  ;;  %553 = vst [vmem:[%s1116_s25 + $0xd8] sm:$0xff] %v489_v33  ;;  %v492_v46 = vadd.f32 %v428_v35, %v298_v34  ;;  %v430_v47 = vmul.f32 %v735_v30, %v1087_v13  ;;  %v301_v48 = vmul.f32 %v1081_v8, %v236_v31  ;;  %v746_v22 = vld [vmem:[%s1066_s19 + $0x358] sm:$0xff]  ;;  %v747_v28 = vld [vmem:[%s1066_s19 + $0x360] sm:$0xff]  ;;  %v748_v30 = vld [vmem:[%s1066_s19 + $0x368] sm:$0xff] }
  0x64   : > { %v431_v49 = vmul.f32 %v736_v32, %v1087_v13  ;;  %554 = vst [vmem:[%s1116_s25 + $0xe0] sm:$0xff] %v490_v40  ;;  %555 = vst [vmem:[%s1116_s25 + $0xe8] sm:$0xff] %v491_v41  ;;  %v493_v53 = vadd.f32 %v429_v42, %v299_v36  ;;  %v302_v54 = vmul.f32 %v1081_v8, %v237_v37  ;;  %v249_v35 = vld [vmem:[%s1066_s19 + $0x170] sm:$0xff]  ;;  %v250_v37 = vld [vmem:[%s1066_s19 + $0x178] sm:$0xff] }
  0x65   : > { %v432_v55 = vmul.f32 %v737_v38, %v1087_v13  ;;  %v303_v56 = vmul.f32 %v1081_v8, %v238_v39  ;;  %556 = vst [vmem:[%s1116_s25 + $0xf0] sm:$0xff] %v492_v46  ;;  %v494_v60 = vadd.f32 %v430_v47, %v300_v43  ;;  %v433_v62 = vmul.f32 %v738_v44, %v1087_v13  ;;  %v749_v36 = vld [vmem:[%s1066_s19 + $0x370] sm:$0xff]  ;;  %v750_v42 = vld [vmem:[%s1066_s19 + $0x378] sm:$0xff]  ;;  %v251_v43 = vld [vmem:[%s1066_s19 + $0x180] sm:$0xff] }
  0x66   : > { %v495_v61 = vadd.f32 %v431_v49, %v301_v48  ;;  %v304_v63 = vmul.f32 %v1081_v8, %v239_v45  ;;  %557 = vst [vmem:[%s1116_s25 + $0xf8] sm:$0xff] %v493_v53  ;;  %v434_v3 = vmul.f32 %v739_v50, %v1087_v13  ;;  %v305_v4 = vmul.f32 %v1081_v8, %v240_v51  ;;  %v751_v48 = vld [vmem:[%s1066_s19 + $0x380] sm:$0xff]  ;;  %v252_v49 = vld [vmem:[%s1066_s19 + $0x188] sm:$0xff] }
  0x67   : > { %v496_v2 = vadd.f32 %v432_v55, %v302_v54  ;;  %v435_v5 = vmul.f32 %v740_v52, %v1087_v13  ;;  %558 = vst [vmem:[%s1116_s25 + $0x100] sm:$0xff] %v494_v60  ;;  %v497_v10 = vadd.f32 %v433_v62, %v303_v56  ;;  %v306_v11 = vmul.f32 %v1081_v8, %v241_v57  ;;  %v752_v50 = vld [vmem:[%s1066_s19 + $0x388] sm:$0xff]  ;;  %v253_v55 = vld [vmem:[%s1066_s19 + $0x190] sm:$0xff]  ;;  %v254_v57 = vld [vmem:[%s1066_s19 + $0x198] sm:$0xff] }
  0x68   : > { %559 = vst [vmem:[%s1116_s25 + $0x108] sm:$0xff] %v495_v61  ;;  %v436_v12 = vmul.f32 %v741_v58, %v1087_v13  ;;  %v307_v14 = vmul.f32 %v1081_v8, %v242_v59  ;;  %v498_v18 = vadd.f32 %v434_v3, %v304_v63  ;;  %v437_v20 = vmul.f32 %v742_v0, %v1087_v13  ;;  %v753_v56 = vld [vmem:[%s1066_s19 + $0x390] sm:$0xff]  ;;  %v754_v62 = vld [vmem:[%s1066_s19 + $0x398] sm:$0xff]  ;;  %v255_v63 = vld [vmem:[%s1066_s19 + $0x1a0] sm:$0xff] }
  0x69   : > { %560 = vst [vmem:[%s1116_s25 + $0x110] sm:$0xff] %v496_v2  ;;  %v499_v19 = vadd.f32 %v435_v5, %v305_v4  ;;  %v308_v21 = vmul.f32 %v1081_v8, %v243_v1  ;;  %561 = vst [vmem:[%s1116_s25 + $0x118] sm:$0xff] %v497_v10  ;;  %v438_v25 = vmul.f32 %v743_v6, %v1087_v13  ;;  %v755_v4 = vld [vmem:[%s1066_s19 + $0x3a0] sm:$0xff]  ;;  %v256_v5 = vld [vmem:[%s1066_s19 + $0x1a8] sm:$0xff] }
  0x6a   : > { %v500_v24 = vadd.f32 %v436_v12, %v306_v11  ;;  %v309_v26 = vmul.f32 %v1081_v8, %v244_v7  ;;  %v439_v27 = vmul.f32 %v744_v9, %v1087_v13  ;;  %562 = vst [vmem:[%s1116_s25 + $0x120] sm:$0xff] %v498_v18  ;;  %v501_v31 = vadd.f32 %v437_v20, %v307_v14  ;;  %v756_v6 = vld [vmem:[%s1066_s19 + $0x3a8] sm:$0xff]  ;;  %v257_v12 = vld [vmem:[%s1066_s19 + $0x1b0] sm:$0xff]  ;;  %v758_v20 = vld [vmem:[%s1066_s19 + $0x3b8] sm:$0xff] }
  0x6b   : > { %563 = vst [vmem:[%s1116_s25 + $0x128] sm:$0xff] %v499_v19  ;;  %v310_v32 = vmul.f32 %v1081_v8, %v245_v15  ;;  %v440_v33 = vmul.f32 %v745_v16, %v1087_v13  ;;  %v311_v34 = vmul.f32 %v1081_v8, %v246_v17  ;;  %v502_v38 = vadd.f32 %v438_v25, %v308_v21  ;;  %v757_v14 = vld [vmem:[%s1066_s19 + $0x3b0] sm:$0xff]  ;;  %v258_v15 = vld [vmem:[%s1066_s19 + $0x1b8] sm:$0xff]  ;;  %v259_v21 = vld [vmem:[%s1066_s19 + $0x1c0] sm:$0xff] }
  0x6c   : > { %564 = vst [vmem:[%s1116_s25 + $0x130] sm:$0xff] %v500_v24  ;;  %v503_v39 = vadd.f32 %v439_v27, %v309_v26  ;;  %v441_v40 = vmul.f32 %v746_v22, %v1087_v13  ;;  %v312_v41 = vmul.f32 %v1081_v8, %v247_v23  ;;  %565 = vst [vmem:[%s1116_s25 + $0x138] sm:$0xff] %v501_v31  ;;  %v759_v26 = vld [vmem:[%s1066_s19 + $0x3c0] sm:$0xff]  ;;  %v260_v27 = vld [vmem:[%s1066_s19 + $0x1c8] sm:$0xff] }
  0x6d   : > { %v504_v44 = vadd.f32 %v440_v33, %v310_v32  ;;  %v442_v45 = vmul.f32 %v747_v28, %v1087_v13  ;;  %v313_v46 = vmul.f32 %v1081_v8, %v248_v29  ;;  %v443_v47 = vmul.f32 %v748_v30, %v1087_v13  ;;  %566 = vst [vmem:[%s1116_s25 + $0x140] sm:$0xff] %v502_v38  ;;  %v760_v28 = vld [vmem:[%s1066_s19 + $0x3c8] sm:$0xff]  ;;  %v261_v33 = vld [vmem:[%s1066_s19 + $0x1d0] sm:$0xff] }
  0x6e   : > { %567 = vst [vmem:[%s1116_s25 + $0x148] sm:$0xff] %v503_v39  ;;  %v505_v51 = vadd.f32 %v441_v40, %v311_v34  ;;  %v314_v52 = vmul.f32 %v1081_v8, %v249_v35  ;;  %v444_v53 = vmul.f32 %v749_v36, %v1087_v13  ;;  %v315_v54 = vmul.f32 %v1081_v8, %v250_v37  ;;  %v761_v34 = vld [vmem:[%s1066_s19 + $0x3d0] sm:$0xff]  ;;  %v262_v35 = vld [vmem:[%s1066_s19 + $0x1d8] sm:$0xff] }
  0x6f   : > { %568 = vst [vmem:[%s1116_s25 + $0x150] sm:$0xff] %v504_v44  ;;  %v506_v58 = vadd.f32 %v442_v45, %v312_v41  ;;  %v507_v59 = vadd.f32 %v443_v47, %v313_v46  ;;  %v445_v60 = vmul.f32 %v750_v42, %v1087_v13  ;;  %v316_v61 = vmul.f32 %v1081_v8, %v251_v43  ;;  %v762_v40 = vld [vmem:[%s1066_s19 + $0x3d8] sm:$0xff]  ;;  %v263_v41 = vld [vmem:[%s1066_s19 + $0x1e0] sm:$0xff]  ;;  %v264_v47 = vld [vmem:[%s1066_s19 + $0x1e8] sm:$0xff] }
  0x70   : > { %569 = vst [vmem:[%s1116_s25 + $0x158] sm:$0xff] %v505_v51  ;;  %v508_v0 = vadd.f32 %v444_v53, %v314_v52  ;;  %v446_v1 = vmul.f32 %v751_v48, %v1087_v13  ;;  %v317_v2 = vmul.f32 %v1081_v8, %v252_v49  ;;  %v447_v3 = vmul.f32 %v752_v50, %v1087_v13  ;;  %v763_v46 = vld [vmem:[%s1066_s19 + $0x3e0] sm:$0xff]  ;;  %v764_v48 = vld [vmem:[%s1066_s19 + $0x3e8] sm:$0xff]  ;;  %v265_v53 = vld [vmem:[%s1066_s19 + $0x1f0] sm:$0xff] }
  0x71   : > { %570 = vst [vmem:[%s1116_s25 + $0x160] sm:$0xff] %v506_v58  ;;  %571 = vst [vmem:[%s1116_s25 + $0x168] sm:$0xff] %v507_v59  ;;  %v509_v7 = vadd.f32 %v445_v60, %v315_v54  ;;  %v318_v9 = vmul.f32 %v1081_v8, %v253_v55  ;;  %v448_v10 = vmul.f32 %v753_v56, %v1087_v13  ;;  %v765_v54 = vld [vmem:[%s1066_s19 + $0x3f0] sm:$0xff]  ;;  %v266_v55 = vld [vmem:[%s1066_s19 + $0x1f8] sm:$0xff] }
  0x72   : > { %v319_v11 = vmul.f32 %v1081_v8, %v254_v57  ;;  %572 = vst [vmem:[%s1116_s25 + $0x170] sm:$0xff] %v508_v0  ;;  %v510_v16 = vadd.f32 %v446_v1, %v316_v61  ;;  %v511_v17 = vadd.f32 %v447_v3, %v317_v2  ;;  %v449_v18 = vmul.f32 %v754_v62, %v1087_v13  ;;  %v766_v60 = vld [vmem:[%s1066_s19 + $0x3f8] sm:$0xff] }
  0x73   : > { %v320_v19 = vmul.f32 %v1081_v8, %v255_v63  ;;  %573 = vst [vmem:[%s1116_s25 + $0x178] sm:$0xff] %v509_v7  ;;  %v512_v22 = vadd.f32 %v448_v10, %v318_v9  ;;  %v450_v23 = vmul.f32 %v755_v4, %v1087_v13  ;;  %v321_v24 = vmul.f32 %v1081_v8, %v256_v5 }
  0x74   : > { %v451_v25 = vmul.f32 %v756_v6, %v1087_v13  ;;  %574 = vst [vmem:[%s1116_s25 + $0x180] sm:$0xff] %v510_v16  ;;  %575 = vst [vmem:[%s1116_s25 + $0x188] sm:$0xff] %v511_v17  ;;  %v513_v29 = vadd.f32 %v449_v18, %v319_v11  ;;  %v322_v30 = vmul.f32 %v1081_v8, %v257_v12 }
  0x75   : > { %v452_v31 = vmul.f32 %v757_v14, %v1087_v13  ;;  %v323_v32 = vmul.f32 %v1081_v8, %v258_v15  ;;  %576 = vst [vmem:[%s1116_s25 + $0x190] sm:$0xff] %v512_v22  ;;  %v514_v36 = vadd.f32 %v450_v23, %v320_v19  ;;  %v453_v38 = vmul.f32 %v758_v20, %v1087_v13 }
  0x76   : > { %v515_v37 = vadd.f32 %v451_v25, %v321_v24  ;;  %v324_v39 = vmul.f32 %v1081_v8, %v259_v21  ;;  %577 = vst [vmem:[%s1116_s25 + $0x198] sm:$0xff] %v513_v29  ;;  %v454_v43 = vmul.f32 %v759_v26, %v1087_v13  ;;  %v325_v44 = vmul.f32 %v1081_v8, %v260_v27 }
  0x77   : > { %v516_v42 = vadd.f32 %v452_v31, %v322_v30  ;;  %v455_v45 = vmul.f32 %v760_v28, %v1087_v13  ;;  %578 = vst [vmem:[%s1116_s25 + $0x1a0] sm:$0xff] %v514_v36  ;;  %v517_v49 = vadd.f32 %v453_v38, %v323_v32  ;;  %v326_v50 = vmul.f32 %v1081_v8, %v261_v33 }
  0x78   : > { %579 = vst [vmem:[%s1116_s25 + $0x1a8] sm:$0xff] %v515_v37  ;;  %v456_v51 = vmul.f32 %v761_v34, %v1087_v13  ;;  %v327_v52 = vmul.f32 %v1081_v8, %v262_v35  ;;  %v518_v56 = vadd.f32 %v454_v43, %v324_v39  ;;  %v457_v58 = vmul.f32 %v762_v40, %v1087_v13 }
  0x79   : > { %580 = vst [vmem:[%s1116_s25 + $0x1b0] sm:$0xff] %v516_v42  ;;  %v519_v57 = vadd.f32 %v455_v45, %v325_v44  ;;  %v328_v59 = vmul.f32 %v1081_v8, %v263_v41  ;;  %581 = vst [vmem:[%s1116_s25 + $0x1b8] sm:$0xff] %v517_v49  ;;  %v458_v62 = vmul.f32 %v763_v46, %v1087_v13 }
  0x7a   : > { %v520_v61 = vadd.f32 %v456_v51, %v326_v50  ;;  %v329_v63 = vmul.f32 %v1081_v8, %v264_v47  ;;  %v459_v0 = vmul.f32 %v764_v48, %v1087_v13  ;;  %582 = vst [vmem:[%s1116_s25 + $0x1c0] sm:$0xff] %v518_v56  ;;  %v521_v1 = vadd.f32 %v457_v58, %v327_v52 }
  0x7b   : > { %583 = vst [vmem:[%s1116_s25 + $0x1c8] sm:$0xff] %v519_v57  ;;  %v330_v2 = vmul.f32 %v1081_v8, %v265_v53  ;;  %v460_v3 = vmul.f32 %v765_v54, %v1087_v13  ;;  %v331_v4 = vmul.f32 %v1081_v8, %v266_v55  ;;  %v522_v5 = vadd.f32 %v458_v62, %v328_v59 }
  0x7c   : > { %584 = vst [vmem:[%s1116_s25 + $0x1d0] sm:$0xff] %v520_v61  ;;  %v523_v6 = vadd.f32 %v459_v0, %v329_v63  ;;  %v461_v7 = vmul.f32 %v766_v60, %v1087_v13  ;;  %585 = vst [vmem:[%s1116_s25 + $0x1d8] sm:$0xff] %v521_v1 }
  0x7d   : > { %v524_v9 = vadd.f32 %v460_v3, %v330_v2  ;;  %586 = vst [vmem:[%s1116_s25 + $0x1e0] sm:$0xff] %v522_v5 }
  0x7e   : > { %587 = vst [vmem:[%s1116_s25 + $0x1e8] sm:$0xff] %v523_v6  ;;  %v525_v8 = vadd.f32 %v461_v7, %v331_v4 }
  0x7f   : > { %588 = vst [vmem:[%s1116_s25 + $0x1f0] sm:$0xff] %v524_v9 }
  0x80   : > { %589 = vst [vmem:[%s1116_s25 + $0x1f8] sm:$0xff] %v525_v8 }
  0x81   : > { %867 = shalt.err (!%p864_p3)
}
  0x82   : > { %s868_s8 = scalar_lea.hbm %s1402_s29, 8192  ;;  %s872_s24 = scalar_lea.hbm %s1454_s2, 16384 }
  0x83   : > { %p869_p7 = scmp.ne.s32.totalorder %s1402_s29, %s868_s8  ;;  %p873_p10 = scmp.lt.u32.totalorder %s1402_s29, %s1454_s2 }
  0x84   : > { %p874_p4 = scmp.lt.u32.totalorder %s872_s24, %s868_s8  ;;  %p876_p6 = scmp.lt.u32.totalorder %s868_s8, %s1402_s29 }
  0x85   : > { %p870_p8 = pnand %p869_p7, %p1003_p11 }
  0x86   : > { %p875_p5 = por %p874_p4, %p873_p10 }
  0x87   : > { %p871_p9 = pneg %p870_p8 }
  0x88   : > { %p877_p13 = por %p876_p6, %p875_p5 }
  0x8a   : > { %p878_p2 = pnand %p877_p13, %p871_p9 }
  0x8c   : > { %881 = shalt.err (!%p878_p2)
}
  0x8d   : > { %s934_s17 = smov 128   ;;  %s935_s20 = smov 8  }
  0x8e   : > { %787 = dma.vmem_to_hbm [thread:$0]  (%p1003_p11), %s1404_s27, 8192, %s1402_s29, %s591_s30, %s934_s17, %s934_s17, %s935_s20  }
  0x8f PF: > { %s619_s25 = sand.u32 1, %s912_s9   ;;  %p794_p0 = pnand %p692_p1, %p1007_p12 }
  0x90   : > { %s620_s26 = scalar_lea.sflag [#allocation4], %s619_s25 }
  0x91   : > { %907 = dma.done.wait (!%p794_p0), %s620_s26, 8192  }
  0x92   : > { %909 = vsyncadd (!%p794_p0), %s620_s26, 4294959104  ;;  %p16_p3 = scmp.ge.s32.totalorder %s976_s15, 4   ;;  %s1460_s9 = smov %s916_s10 }
  0x93   : > { %s1461_s10 = smov %s920_s11  ;;  %s1462_s11 = smov %s988_s18 }
  0x94   : > { %s1463_s12 = smov %s976_s15  ;;  %18 = sbr.rel (!%p16_p3) target bundleno = 6 (0x6), region = 84 }
  0x9b   :  { %625 = vsyncpa [#allocation3], 1 }
  0x9c   :  { %627 = vsyncpa [#allocation3 + $0x1], 1 }
  0x9d   :  { %628 = vsyncpa [#allocation4], 1 }
  0x9e   :  { %630 = vsyncpa [#allocation4 + $0x1], 1 }
  0x9f   :  { %631 = vsyncpa [#allocation5], 1 }
  0xa0   :  { %633 = vsyncpa [#allocation5 + $0x1], 1 }

</bundles_post_ra>
